<compile_context>
chip_gen: v5e
topology: v5e:2x2
jax: 0.10.0
libtpu: 0.0.40
codegen_flags: <defaults>
</compile_context>

<pallas_src>
import functools

import jax
import jax.numpy as jnp
from jax import lax
from jax.experimental import pallas as pl
from jax.experimental.pallas import tpu as pltpu


def _loss_mask_kernel(N, den_ref, ref_ref, tra_ref, occ_ref,
                      pt1_ref, po1_ref, pt2_ref, po2_ref,
                      out_ref, acc_sum_ref, acc_cnt_ref):
    i = pl.program_id(0)

    @pl.when(i == 0)
    def _init():
        acc_sum_ref[...] = jnp.zeros_like(acc_sum_ref)
        acc_cnt_ref[...] = jnp.zeros_like(acc_cnt_ref)

    diff = jnp.abs(ref_ref[...] - den_ref[...])            # (3N, T)
    a_cur = jnp.abs(occ_ref[...] - tra_ref[...])           # (2N, T)
    a_p1 = jnp.abs(po1_ref[...] - pt1_ref[...])            # (2N, T)
    a_p2 = jnp.abs(po2_ref[...] - pt2_ref[...])            # (2N, T)

    def pair_flag(adiff, n):
        # OR over the 2 MV channels of batch n == (sublane max, then 1 compare).
        m = jnp.max(adiff[2 * n:2 * n + 2, :], axis=0, keepdims=True)  # (1, T)
        return (m > 0.5).astype(jnp.float32)

    step_sum = None
    step_cnt = None
    mask_b0 = None
    for n in range(N):                                     # static, small N
        blk = diff[3 * n:3 * n + 3, :]                     # (3, T)
        a_n = jnp.sum(blk, axis=0, keepdims=True)          # sum_c |ref - den|
        b_n = jnp.sum((blk > 0.0).astype(jnp.float32), axis=0, keepdims=True)

        m_n = (pair_flag(a_cur, n)
               + jnp.float32(0.8) * pair_flag(a_p1, n)
               + jnp.float32(0.6) * pair_flag(a_p2, n))    # (1, T), mask >= 0
        if n == 0:
            mask_b0 = m_n

        s_n = a_n * m_n                                    # sum_c L[n, c, p]
        c_n = b_n * (m_n > 0.0).astype(jnp.float32)        # count_c (L > 0)
        step_sum = s_n if step_sum is None else step_sum + s_n
        step_cnt = c_n if step_cnt is None else step_cnt + c_n

    acc_sum_ref[...] += step_sum
    acc_cnt_ref[...] += step_cnt

    @pl.when(i == 0)
    def _fix_first_element():
        # Emulate lossL1matrix[0, 0, 0, 0] = 1e-4: remove that element's
        # original contribution and add the (always positive) 1e-4 instead.
        lane0 = lax.broadcasted_iota(jnp.int32, mask_b0.shape, 1) == 0
        d00 = diff[0:1, :]                                 # batch 0, channel 0
        orig_sum = d00 * mask_b0
        orig_cnt = ((d00 > 0.0) & (mask_b0 > 0.0)).astype(jnp.float32)
        acc_sum_ref[...] += jnp.where(lane0, jnp.float32(1e-4) - orig_sum, 0.0)
        acc_cnt_ref[...] += jnp.where(lane0, 1.0 - orig_cnt, 0.0)

    @pl.when(i == pl.num_programs(0) - 1)
    def _finalize():
        total = jnp.sum(acc_sum_ref[...], axis=1, keepdims=True)   # (1, 1)
        count = jnp.sum(acc_cnt_ref[...], axis=1, keepdims=True)   # (1, 1)
        loss = total / count
        out_ref[...] = jnp.where(loss < 0.002, jnp.zeros_like(loss), loss)


def _round_up(x, m):
    return -(-x // m) * m


def _plan_tiling(num_pixels, per_lane_bytes, budget_bytes, lane_cap=None):
    """Pick (tile, grid) with tile a multiple of 128 and tile * grid >= P."""
    max_tile = max(128, (budget_bytes // per_lane_bytes) // 128 * 128)
    if lane_cap is not None:
        max_tile = max(128, min(max_tile, (lane_cap // 128) * 128))

    p128 = _round_up(num_pixels, 128)
    if p128 <= max_tile:
        return p128, 1

    # Prefer a reasonably large multiple-of-128 divisor of P (no padding).
    if num_pixels % 128 == 0:
        floor_t = max(1024, max_tile // 4)
        t = max_tile
        while t >= floor_t:
            if num_pixels % t == 0:
                return t, num_pixels // t
            t -= 128

    # Otherwise zero-pad the pixel axis; padded pixels contribute 0 to both
    # the masked sum and the positive count.
    g = -(-num_pixels // max_tile)
    tile = _round_up(-(-num_pixels // g), 128)
    return tile, g


def loss_mask(denoise, reference, traMV, currentOccMV,
              preTraMV1, preOccMV1, preTraMV2, preOccMV2, *, lane_cap=None):
    N, _, H, W = denoise.shape
    P = H * W

    # Generation-aware VMEM budget: ~48 MiB scoped limit on v7x (64 MiB
    # physical), ~96 MiB on v5e/v6e (128 MiB physical).
    try:
        vmem_cap = int(pltpu.get_tpu_info().vmem_capacity_bytes)
    except Exception:
        vmem_cap = 64 * 1024 * 1024
    vmem_limit = max(min(vmem_cap * 3 // 4, 96 * 1024 * 1024), 32 * 1024 * 1024)
    budget = max(vmem_limit - 8 * 1024 * 1024, 16 * 1024 * 1024)

    # Real sublane-padded VMEM footprint per lane of the pixel tile:
    # 8 double-buffered input blocks + 2 persistent accumulator rows + an
    # allowance for Mosaic-materialized elementwise intermediates.
    rows_dr = _round_up(3 * N, 8)
    rows_mv = _round_up(2 * N, 8)
    per_lane = (2 * 4 * (2 * rows_dr + 6 * rows_mv)      # inputs, double-buffered
                + 4 * 2 * 8                              # 2 accumulator scratch rows
                + 4 * (rows_dr + 3 * rows_mv + 16))      # live intermediates

    tile, grid_n = _plan_tiling(P, per_lane, budget, lane_cap)
    p_pad = tile * grid_n

    def flat(x):                                         # (N, C, H, W) -> (N*C, P_pad)
        y = x.reshape(x.shape[0] * x.shape[1], P)
        if p_pad != P:
            y = jnp.pad(y, ((0, 0), (0, p_pad - P)))
        return y

    args = tuple(flat(a) for a in (denoise, reference, traMV, currentOccMV,
                                   preTraMV1, preOccMV1, preTraMV2, preOccMV2))

    def spec(rows):
        return pl.BlockSpec((rows, tile), lambda i: (0, i))

    in_specs = [spec(3 * N), spec(3 * N)] + [spec(2 * N) for _ in range(6)]

    bytes_accessed = int(sum(a.size for a in args) * 4 + 4)
    flops = int(40 * N * p_pad)

    out = pl.pallas_call(
        functools.partial(_loss_mask_kernel, N),
        out_shape=jax.ShapeDtypeStruct((1, 1), jnp.float32),
        grid_spec=pltpu.PrefetchScalarGridSpec(
            num_scalar_prefetch=0,
            grid=(grid_n,),
            in_specs=in_specs,
            out_specs=pl.BlockSpec((1, 1), lambda i: (0, 0)),
            scratch_shapes=[pltpu.VMEM((1, tile), jnp.float32),
                            pltpu.VMEM((1, tile), jnp.float32)],
        ),
        compiler_params=pltpu.CompilerParams(
            dimension_semantics=("arbitrary",),
            vmem_limit_bytes=int(vmem_limit),
        ),
        cost_estimate=pl.CostEstimate(flops=flops, transcendentals=0,
                                      bytes_accessed=bytes_accessed),
    )(*args)
    return out[0, 0]


def loss_mask_ref(denoise, reference, traMV, currentOccMV,
                  preTraMV1, preOccMV1, preTraMV2, preOccMV2):
    """Pure-JAX reference mirroring the PyTorch module exactly."""
    def mk(occ, tra, val):
        d = jnp.where(jnp.abs(occ - tra) > 0.5, 1.0, 0.0)
        s = d[:, 0:1] + d[:, 1:2]
        return jnp.where(jnp.abs(s) > 0.0, val, 0.0)

    mask = (mk(currentOccMV, traMV, 1.0)
            + mk(preOccMV1, preTraMV1, 0.8)
            + mk(preOccMV2, preTraMV2, 0.6))
    L = jnp.abs(reference - denoise) * mask
    L = L.at[0, 0, 0, 0].set(1e-4)
    pos = L > 0.0
    loss = jnp.sum(jnp.where(pos, L, 0.0)) / jnp.sum(pos.astype(jnp.float32))
    return jnp.where(loss < 0.002, 0.0, loss)


if __name__ == "__main__":
    def make_inputs(keys, N, H, W):
        return (
            jax.random.uniform(keys[0], (N, 3, H, W), dtype=jnp.float32),
            jax.random.uniform(keys[1], (N, 3, H, W), dtype=jnp.float32),
            jax.random.normal(keys[2], (N, 2, H, W), dtype=jnp.float32),
            jax.random.normal(keys[3], (N, 2, H, W), dtype=jnp.float32),
            jax.random.normal(keys[4], (N, 2, H, W), dtype=jnp.float32),
            jax.random.normal(keys[5], (N, 2, H, W), dtype=jnp.float32),
            jax.random.normal(keys[6], (N, 2, H, W), dtype=jnp.float32),
            jax.random.normal(keys[7], (N, 2, H, W), dtype=jnp.float32),
        )

    # Case 1: original toy shape — single grid step, lane-dense P = 256.
    ks = jax.random.split(jax.random.PRNGKey(0), 8)
    args = make_inputs(ks, 2, 16, 16)
    loss = loss_mask(*args)
    jax.block_until_ready(loss)
    ref = loss_mask_ref(*args)
    jax.block_until_ready(ref)
    assert jnp.allclose(loss, ref, rtol=1e-4, atol=1e-6), (loss, ref)

    # Case 2: forced 128-lane tile (32 grid steps) to exercise the
    # init / accumulate / first-element-fix / finalize paths.
    ks2 = jax.random.split(jax.random.PRNGKey(1), 8)
    args2 = make_inputs(ks2, 2, 64, 64)
    loss2 = loss_mask(*args2, lane_cap=128)
    jax.block_until_ready(loss2)
    ref2 = loss_mask_ref(*args2)
    jax.block_until_ready(ref2)
    assert jnp.allclose(loss2, ref2, rtol=1e-4, atol=1e-6), (loss2, ref2)

    # Case 3: P = 24*40 = 960 (not a multiple of 128) with a 256-lane cap —
    # exercises the zero-padding path (padded pixels contribute nothing).
    ks3 = jax.random.split(jax.random.PRNGKey(2), 8)
    args3 = make_inputs(ks3, 2, 24, 40)
    loss3 = loss_mask(*args3, lane_cap=256)
    jax.block_until_ready(loss3)
    ref3 = loss_mask_ref(*args3)
    jax.block_until_ready(ref3)
    assert jnp.allclose(loss3, ref3, rtol=1e-4, atol=1e-6), (loss3, ref3)

    print("KERNEL_OK")
</pallas_src>

<mosaic_0001>
module attributes {stable_mosaic.version = 11 : i64} {
  func.func @_loss_mask_kernel(%arg0: i32, %arg1: memref<6x256xf32, #tpu.memory_space<vmem>>, %arg2: memref<6x256xf32, #tpu.memory_space<vmem>>, %arg3: memref<4x256xf32, #tpu.memory_space<vmem>>, %arg4: memref<4x256xf32, #tpu.memory_space<vmem>>, %arg5: memref<4x256xf32, #tpu.memory_space<vmem>>, %arg6: memref<4x256xf32, #tpu.memory_space<vmem>>, %arg7: memref<4x256xf32, #tpu.memory_space<vmem>>, %arg8: memref<4x256xf32, #tpu.memory_space<vmem>>, %arg9: memref<1x1xf32, #tpu.memory_space<vmem>>, %arg10: memref<1x256xf32, #tpu.memory_space<vmem>>, %arg11: memref<1x256xf32, #tpu.memory_space<vmem>>) attributes {dimension_semantics = [#tpu.dimension_semantics<arbitrary>], iteration_bounds = array<i64: 1>, scalar_prefetch = 0 : i64, scratch_operands = 2 : i64, tpu.core_type = #tpu.core_type<tc>, window_params = [{transform_indices = @transform_0, window_bounds = array<i64: 6, 256>}, {transform_indices = @transform_1, window_bounds = array<i64: 6, 256>}, {transform_indices = @transform_2, window_bounds = array<i64: 4, 256>}, {transform_indices = @transform_3, window_bounds = array<i64: 4, 256>}, {transform_indices = @transform_4, window_bounds = array<i64: 4, 256>}, {transform_indices = @transform_5, window_bounds = array<i64: 4, 256>}, {transform_indices = @transform_6, window_bounds = array<i64: 4, 256>}, {transform_indices = @transform_7, window_bounds = array<i64: 4, 256>}, {pipeline_mode = #tpu.pipeline_mode<synchronous>, transform_indices = @transform_8, window_bounds = array<i64: 1, 1>}]} {
    %c0_i32 = arith.constant 0 : i32
    %0 = arith.cmpi eq, %arg0, %c0_i32 : i32
    %1 = arith.extui %0 : i1 to i32
    %c0_i32_0 = arith.constant 0 : i32
    %2 = arith.cmpi ne, %1, %c0_i32_0 : i32
    scf.if %2 {
      %cst_51 = arith.constant 0.000000e+00 : f32
      %117 = vector.broadcast %cst_51 : f32 to vector<1x256xf32>
      %c0_52 = arith.constant 0 : index
      %c0_53 = arith.constant 0 : index
      %118 = vector.load %arg10[%c0_52, %c0_53] : memref<1x256xf32, #tpu.memory_space<vmem>>, vector<1x256xf32>
      tpu.vector_store %arg10[%c0_52, %c0_53], %117 {strides = array<i32>} : memref<1x256xf32, #tpu.memory_space<vmem>>, vector<1x256xf32>,
      %cst_54 = arith.constant 0.000000e+00 : f32
      %119 = vector.broadcast %cst_54 : f32 to vector<1x256xf32>
      %c0_55 = arith.constant 0 : index
      %c0_56 = arith.constant 0 : index
      %120 = vector.load %arg11[%c0_55, %c0_56] : memref<1x256xf32, #tpu.memory_space<vmem>>, vector<1x256xf32>
      tpu.vector_store %arg11[%c0_55, %c0_56], %119 {strides = array<i32>} : memref<1x256xf32, #tpu.memory_space<vmem>>, vector<1x256xf32>,
    } else {
    }
    %c0 = arith.constant 0 : index
    %c0_1 = arith.constant 0 : index
    %3 = vector.load %arg2[%c0, %c0_1] : memref<6x256xf32, #tpu.memory_space<vmem>>, vector<6x256xf32>
    %c0_2 = arith.constant 0 : index
    %c0_3 = arith.constant 0 : index
    %4 = vector.load %arg1[%c0_2, %c0_3] : memref<6x256xf32, #tpu.memory_space<vmem>>, vector<6x256xf32>
    %5 = arith.subf %3, %4 : vector<6x256xf32>
    %6 = math.absf %5 : vector<6x256xf32>
    %c0_4 = arith.constant 0 : index
    %c0_5 = arith.constant 0 : index
    %7 = vector.load %arg4[%c0_4, %c0_5] : memref<4x256xf32, #tpu.memory_space<vmem>>, vector<4x256xf32>
    %c0_6 = arith.constant 0 : index
    %c0_7 = arith.constant 0 : index
    %8 = vector.load %arg3[%c0_6, %c0_7] : memref<4x256xf32, #tpu.memory_space<vmem>>, vector<4x256xf32>
    %9 = arith.subf %7, %8 : vector<4x256xf32>
    %10 = math.absf %9 : vector<4x256xf32>
    %c0_8 = arith.constant 0 : index
    %c0_9 = arith.constant 0 : index
    %11 = vector.load %arg6[%c0_8, %c0_9] : memref<4x256xf32, #tpu.memory_space<vmem>>, vector<4x256xf32>
    %c0_10 = arith.constant 0 : index
    %c0_11 = arith.constant 0 : index
    %12 = vector.load %arg5[%c0_10, %c0_11] : memref<4x256xf32, #tpu.memory_space<vmem>>, vector<4x256xf32>
    %13 = arith.subf %11, %12 : vector<4x256xf32>
    %14 = math.absf %13 : vector<4x256xf32>
    %c0_12 = arith.constant 0 : index
    %c0_13 = arith.constant 0 : index
    %15 = vector.load %arg8[%c0_12, %c0_13] : memref<4x256xf32, #tpu.memory_space<vmem>>, vector<4x256xf32>
    %c0_14 = arith.constant 0 : index
    %c0_15 = arith.constant 0 : index
    %16 = vector.load %arg7[%c0_14, %c0_15] : memref<4x256xf32, #tpu.memory_space<vmem>>, vector<4x256xf32>
    %17 = arith.subf %15, %16 : vector<4x256xf32>
    %18 = math.absf %17 : vector<4x256xf32>
    %19 = vector.extract_strided_slice %6 {offsets = [0, 0], sizes = [3, 256], strides = [1, 1]} : vector<6x256xf32> to vector<3x256xf32>
    %cst = arith.constant dense<0.000000e+00> : vector<256xf32>
    %20 = vector.multi_reduction <add>, %19, %cst [0] : vector<3x256xf32> to vector<256xf32>
    %21 = vector.shape_cast %20 : vector<256xf32> to vector<1x256xf32>
    %cst_16 = arith.constant 0.000000e+00 : f32
    %22 = vector.broadcast %cst_16 : f32 to vector<3x256xf32>
    %23 = arith.cmpf ogt, %19, %22 : vector<3x256xf32>
    %24 = arith.extui %23 : vector<3x256xi1> to vector<3x256xi32>
    %25 = arith.sitofp %24 : vector<3x256xi32> to vector<3x256xf32>
    %cst_17 = arith.constant dense<0.000000e+00> : vector<256xf32>
    %26 = vector.multi_reduction <add>, %25, %cst_17 [0] : vector<3x256xf32> to vector<256xf32>
    %27 = vector.shape_cast %26 : vector<256xf32> to vector<1x256xf32>
    %28 = vector.extract_strided_slice %10 {offsets = [0, 0], sizes = [2, 256], strides = [1, 1]} : vector<4x256xf32> to vector<2x256xf32>
    %cst_18 = arith.constant dense<0xFF800000> : vector<256xf32>
    %29 = vector.multi_reduction <maximumf>, %28, %cst_18 [0] : vector<2x256xf32> to vector<256xf32>
    %30 = vector.shape_cast %29 : vector<256xf32> to vector<1x256xf32>
    %cst_19 = arith.constant 5.000000e-01 : f32
    %31 = vector.broadcast %cst_19 : f32 to vector<1x256xf32>
    %32 = arith.cmpf ogt, %30, %31 : vector<1x256xf32>
    %33 = arith.extui %32 : vector<1x256xi1> to vector<1x256xi32>
    %34 = arith.sitofp %33 : vector<1x256xi32> to vector<1x256xf32>
    %35 = vector.extract_strided_slice %14 {offsets = [0, 0], sizes = [2, 256], strides = [1, 1]} : vector<4x256xf32> to vector<2x256xf32>
    %cst_20 = arith.constant dense<0xFF800000> : vector<256xf32>
    %36 = vector.multi_reduction <maximumf>, %35, %cst_20 [0] : vector<2x256xf32> to vector<256xf32>
    %37 = vector.shape_cast %36 : vector<256xf32> to vector<1x256xf32>
    %cst_21 = arith.constant 5.000000e-01 : f32
    %38 = vector.broadcast %cst_21 : f32 to vector<1x256xf32>
    %39 = arith.cmpf ogt, %37, %38 : vector<1x256xf32>
    %40 = arith.extui %39 : vector<1x256xi1> to vector<1x256xi32>
    %41 = arith.sitofp %40 : vector<1x256xi32> to vector<1x256xf32>
    %cst_22 = arith.constant 8.000000e-01 : f32
    %42 = vector.broadcast %cst_22 : f32 to vector<1x256xf32>
    %43 = arith.mulf %42, %41 : vector<1x256xf32>
    %44 = arith.addf %34, %43 : vector<1x256xf32>
    %45 = vector.extract_strided_slice %18 {offsets = [0, 0], sizes = [2, 256], strides = [1, 1]} : vector<4x256xf32> to vector<2x256xf32>
    %cst_23 = arith.constant dense<0xFF800000> : vector<256xf32>
    %46 = vector.multi_reduction <maximumf>, %45, %cst_23 [0] : vector<2x256xf32> to vector<256xf32>
    %47 = vector.shape_cast %46 : vector<256xf32> to vector<1x256xf32>
    %cst_24 = arith.constant 5.000000e-01 : f32
    %48 = vector.broadcast %cst_24 : f32 to vector<1x256xf32>
    %49 = arith.cmpf ogt, %47, %48 : vector<1x256xf32>
    %50 = arith.extui %49 : vector<1x256xi1> to vector<1x256xi32>
    %51 = arith.sitofp %50 : vector<1x256xi32> to vector<1x256xf32>
    %cst_25 = arith.constant 6.000000e-01 : f32
    %52 = vector.broadcast %cst_25 : f32 to vector<1x256xf32>
    %53 = arith.mulf %52, %51 : vector<1x256xf32>
    %54 = arith.addf %44, %53 : vector<1x256xf32>
    %55 = arith.mulf %21, %54 : vector<1x256xf32>
    %cst_26 = arith.constant 0.000000e+00 : f32
    %56 = vector.broadcast %cst_26 : f32 to vector<1x256xf32>
    %57 = arith.cmpf ogt, %54, %56 : vector<1x256xf32>
    %58 = arith.extui %57 : vector<1x256xi1> to vector<1x256xi32>
    %59 = arith.sitofp %58 : vector<1x256xi32> to vector<1x256xf32>
    %60 = arith.mulf %27, %59 : vector<1x256xf32>
    %61 = vector.extract_strided_slice %6 {offsets = [3, 0], sizes = [3, 256], strides = [1, 1]} : vector<6x256xf32> to vector<3x256xf32>
    %cst_27 = arith.constant dense<0.000000e+00> : vector<256xf32>
    %62 = vector.multi_reduction <add>, %61, %cst_27 [0] : vector<3x256xf32> to vector<256xf32>
    %63 = vector.shape_cast %62 : vector<256xf32> to vector<1x256xf32>
    %cst_28 = arith.constant 0.000000e+00 : f32
    %64 = vector.broadcast %cst_28 : f32 to vector<3x256xf32>
    %65 = arith.cmpf ogt, %61, %64 : vector<3x256xf32>
    %66 = arith.extui %65 : vector<3x256xi1> to vector<3x256xi32>
    %67 = arith.sitofp %66 : vector<3x256xi32> to vector<3x256xf32>
    %cst_29 = arith.constant dense<0.000000e+00> : vector<256xf32>
    %68 = vector.multi_reduction <add>, %67, %cst_29 [0] : vector<3x256xf32> to vector<256xf32>
    %69 = vector.shape_cast %68 : vector<256xf32> to vector<1x256xf32>
    %70 = vector.extract_strided_slice %10 {offsets = [2, 0], sizes = [2, 256], strides = [1, 1]} : vector<4x256xf32> to vector<2x256xf32>
    %cst_30 = arith.constant dense<0xFF800000> : vector<256xf32>
    %71 = vector.multi_reduction <maximumf>, %70, %cst_30 [0] : vector<2x256xf32> to vector<256xf32>
    %72 = vector.shape_cast %71 : vector<256xf32> to vector<1x256xf32>
    %cst_31 = arith.constant 5.000000e-01 : f32
    %73 = vector.broadcast %cst_31 : f32 to vector<1x256xf32>
    %74 = arith.cmpf ogt, %72, %73 : vector<1x256xf32>
    %75 = arith.extui %74 : vector<1x256xi1> to vector<1x256xi32>
    %76 = arith.sitofp %75 : vector<1x256xi32> to vector<1x256xf32>
    %77 = vector.extract_strided_slice %14 {offsets = [2, 0], sizes = [2, 256], strides = [1, 1]} : vector<4x256xf32> to vector<2x256xf32>
    %cst_32 = arith.constant dense<0xFF800000> : vector<256xf32>
    %78 = vector.multi_reduction <maximumf>, %77, %cst_32 [0] : vector<2x256xf32> to vector<256xf32>
    %79 = vector.shape_cast %78 : vector<256xf32> to vector<1x256xf32>
    %cst_33 = arith.constant 5.000000e-01 : f32
    %80 = vector.broadcast %cst_33 : f32 to vector<1x256xf32>
    %81 = arith.cmpf ogt, %79, %80 : vector<1x256xf32>
    %82 = arith.extui %81 : vector<1x256xi1> to vector<1x256xi32>
    %83 = arith.sitofp %82 : vector<1x256xi32> to vector<1x256xf32>
    %cst_34 = arith.constant 8.000000e-01 : f32
    %84 = vector.broadcast %cst_34 : f32 to vector<1x256xf32>
    %85 = arith.mulf %84, %83 : vector<1x256xf32>
    %86 = arith.addf %76, %85 : vector<1x256xf32>
    %87 = vector.extract_strided_slice %18 {offsets = [2, 0], sizes = [2, 256], strides = [1, 1]} : vector<4x256xf32> to vector<2x256xf32>
    %cst_35 = arith.constant dense<0xFF800000> : vector<256xf32>
    %88 = vector.multi_reduction <maximumf>, %87, %cst_35 [0] : vector<2x256xf32> to vector<256xf32>
    %89 = vector.shape_cast %88 : vector<256xf32> to vector<1x256xf32>
    %cst_36 = arith.constant 5.000000e-01 : f32
    %90 = vector.broadcast %cst_36 : f32 to vector<1x256xf32>
    %91 = arith.cmpf ogt, %89, %90 : vector<1x256xf32>
    %92 = arith.extui %91 : vector<1x256xi1> to vector<1x256xi32>
    %93 = arith.sitofp %92 : vector<1x256xi32> to vector<1x256xf32>
    %cst_37 = arith.constant 6.000000e-01 : f32
    %94 = vector.broadcast %cst_37 : f32 to vector<1x256xf32>
    %95 = arith.mulf %94, %93 : vector<1x256xf32>
    %96 = arith.addf %86, %95 : vector<1x256xf32>
    %97 = arith.mulf %63, %96 : vector<1x256xf32>
    %cst_38 = arith.constant 0.000000e+00 : f32
    %98 = vector.broadcast %cst_38 : f32 to vector<1x256xf32>
    %99 = arith.cmpf ogt, %96, %98 : vector<1x256xf32>
    %100 = arith.extui %99 : vector<1x256xi1> to vector<1x256xi32>
    %101 = arith.sitofp %100 : vector<1x256xi32> to vector<1x256xf32>
    %102 = arith.mulf %69, %101 : vector<1x256xf32>
    %103 = arith.addf %55, %97 : vector<1x256xf32>
    %104 = arith.addf %60, %102 : vector<1x256xf32>
    %c0_39 = arith.constant 0 : index
    %c0_40 = arith.constant 0 : index
    %105 = vector.load %arg10[%c0_39, %c0_40] : memref<1x256xf32, #tpu.memory_space<vmem>>, vector<1x256xf32>
    %106 = arith.addf %105, %103 : vector<1x256xf32>
    %c0_41 = arith.constant 0 : index
    %c0_42 = arith.constant 0 : index
    %107 = vector.load %arg10[%c0_41, %c0_42] : memref<1x256xf32, #tpu.memory_space<vmem>>, vector<1x256xf32>
    tpu.vector_store %arg10[%c0_41, %c0_42], %106 {strides = array<i32>} : memref<1x256xf32, #tpu.memory_space<vmem>>, vector<1x256xf32>,
    %c0_43 = arith.constant 0 : index
    %c0_44 = arith.constant 0 : index
    %108 = vector.load %arg11[%c0_43, %c0_44] : memref<1x256xf32, #tpu.memory_space<vmem>>, vector<1x256xf32>
    %109 = arith.addf %108, %104 : vector<1x256xf32>
    %c0_45 = arith.constant 0 : index
    %c0_46 = arith.constant 0 : index
    %110 = vector.load %arg11[%c0_45, %c0_46] : memref<1x256xf32, #tpu.memory_space<vmem>>, vector<1x256xf32>
    tpu.vector_store %arg11[%c0_45, %c0_46], %109 {strides = array<i32>} : memref<1x256xf32, #tpu.memory_space<vmem>>, vector<1x256xf32>,
    %c0_i32_47 = arith.constant 0 : i32
    %111 = arith.cmpi eq, %arg0, %c0_i32_47 : i32
    %112 = arith.extui %111 : i1 to i32
    %c0_i32_48 = arith.constant 0 : i32
    %113 = arith.cmpi ne, %112, %c0_i32_48 : i32
    scf.if %113 {
      %117 = tpu.iota {dimensions = array<i32: 1>} : vector<1x256xi32>
      %c0_i32_51 = arith.constant 0 : i32
      %118 = vector.broadcast %c0_i32_51 : i32 to vector<1x256xi32>
      %119 = arith.cmpi eq, %117, %118 : vector<1x256xi32>
      %120 = vector.extract_strided_slice %6 {offsets = [0, 0], sizes = [1, 256], strides = [1, 1]} : vector<6x256xf32> to vector<1x256xf32>
      %121 = arith.mulf %120, %54 : vector<1x256xf32>
      %cst_52 = arith.constant 0.000000e+00 : f32
      %122 = vector.broadcast %cst_52 : f32 to vector<1x256xf32>
      %123 = arith.cmpf ogt, %120, %122 : vector<1x256xf32>
      %cst_53 = arith.constant 0.000000e+00 : f32
      %124 = vector.broadcast %cst_53 : f32 to vector<1x256xf32>
      %125 = arith.cmpf ogt, %54, %124 : vector<1x256xf32>
      %126 = arith.andi %123, %125 : vector<1x256xi1>
      %127 = arith.extui %126 : vector<1x256xi1> to vector<1x256xi32>
      %128 = arith.sitofp %127 : vector<1x256xi32> to vector<1x256xf32>
      %c0_54 = arith.constant 0 : index
      %c0_55 = arith.constant 0 : index
      %129 = vector.load %arg10[%c0_54, %c0_55] : memref<1x256xf32, #tpu.memory_space<vmem>>, vector<1x256xf32>
      %cst_56 = arith.constant 9.99999974E-5 : f32
      %130 = vector.broadcast %cst_56 : f32 to vector<1x256xf32>
      %131 = arith.subf %130, %121 : vector<1x256xf32>
      %cst_57 = arith.constant 0.000000e+00 : f32
      %132 = vector.broadcast %cst_57 : f32 to vector<1x256xf32>
      %133 = arith.select %119, %131, %132 : vector<1x256xi1>, vector<1x256xf32>
      %134 = arith.addf %129, %133 : vector<1x256xf32>
      %c0_58 = arith.constant 0 : index
      %c0_59 = arith.constant 0 : index
      %135 = vector.load %arg10[%c0_58, %c0_59] : memref<1x256xf32, #tpu.memory_space<vmem>>, vector<1x256xf32>
      tpu.vector_store %arg10[%c0_58, %c0_59], %134 {strides = array<i32>} : memref<1x256xf32, #tpu.memory_space<vmem>>, vector<1x256xf32>,
      %c0_60 = arith.constant 0 : index
      %c0_61 = arith.constant 0 : index
      %136 = vector.load %arg11[%c0_60, %c0_61] : memref<1x256xf32, #tpu.memory_space<vmem>>, vector<1x256xf32>
      %cst_62 = arith.constant 1.000000e+00 : f32
      %137 = vector.broadcast %cst_62 : f32 to vector<1x256xf32>
      %138 = arith.subf %137, %128 : vector<1x256xf32>
      %cst_63 = arith.constant 0.000000e+00 : f32
      %139 = vector.broadcast %cst_63 : f32 to vector<1x256xf32>
      %140 = arith.select %119, %138, %139 : vector<1x256xi1>, vector<1x256xf32>
      %141 = arith.addf %136, %140 : vector<1x256xf32>
      %c0_64 = arith.constant 0 : index
      %c0_65 = arith.constant 0 : index
      %142 = vector.load %arg11[%c0_64, %c0_65] : memref<1x256xf32, #tpu.memory_space<vmem>>, vector<1x256xf32>
      tpu.vector_store %arg11[%c0_64, %c0_65], %141 {strides = array<i32>} : memref<1x256xf32, #tpu.memory_space<vmem>>, vector<1x256xf32>,
    } else {
    }
    %c0_i32_49 = arith.constant 0 : i32
    %114 = arith.cmpi eq, %arg0, %c0_i32_49 : i32
    %115 = arith.extui %114 : i1 to i32
    %c0_i32_50 = arith.constant 0 : i32
    %116 = arith.cmpi ne, %115, %c0_i32_50 : i32
    scf.if %116 {
      %c0_51 = arith.constant 0 : index
      %c0_52 = arith.constant 0 : index
      %117 = vector.load %arg10[%c0_51, %c0_52] : memref<1x256xf32, #tpu.memory_space<vmem>>, vector<1x256xf32>
      %cst_53 = arith.constant dense<0.000000e+00> : vector<1xf32>
      %118 = vector.multi_reduction <add>, %117, %cst_53 [1] : vector<1x256xf32> to vector<1xf32>
      %119 = vector.shape_cast %118 : vector<1xf32> to vector<1x1xf32>
      %c0_54 = arith.constant 0 : index
      %c0_55 = arith.constant 0 : index
      %120 = vector.load %arg11[%c0_54, %c0_55] : memref<1x256xf32, #tpu.memory_space<vmem>>, vector<1x256xf32>
      %cst_56 = arith.constant dense<0.000000e+00> : vector<1xf32>
      %121 = vector.multi_reduction <add>, %120, %cst_56 [1] : vector<1x256xf32> to vector<1xf32>
      %122 = vector.shape_cast %121 : vector<1xf32> to vector<1x1xf32>
      %123 = arith.divf %119, %122 : vector<1x1xf32>
      %cst_57 = arith.constant 2.000000e-03 : f32
      %124 = vector.broadcast %cst_57 : f32 to vector<1x1xf32>
      %125 = arith.cmpf olt, %123, %124 : vector<1x1xf32>
      %cst_58 = arith.constant 0.000000e+00 : f32
      %126 = vector.broadcast %cst_58 : f32 to vector<1x1xf32>
      %127 = arith.select %125, %126, %123 : vector<1x1xi1>, vector<1x1xf32>
      %c0_59 = arith.constant 0 : index
      %c0_60 = arith.constant 0 : index
      %128 = vector.load %arg9[%c0_59, %c0_60] : memref<1x1xf32, #tpu.memory_space<vmem>>, vector<1x1xf32>
      tpu.vector_store %arg9[%c0_59, %c0_60], %127 {strides = array<i32>} : memref<1x1xf32, #tpu.memory_space<vmem>>, vector<1x1xf32>,
    } else {
    }
    return
  }
  func.func @transform_0(%arg0: i32) -> (i32, i32) {
    %c0_i32 = arith.constant 0 : i32
    %c0_i32_0 = arith.constant 0 : i32
    return %c0_i32, %arg0 : i32, i32
  }
  func.func @transform_1(%arg0: i32) -> (i32, i32) {
    %c0_i32 = arith.constant 0 : i32
    %c0_i32_0 = arith.constant 0 : i32
    return %c0_i32, %arg0 : i32, i32
  }
  func.func @transform_2(%arg0: i32) -> (i32, i32) {
    %c0_i32 = arith.constant 0 : i32
    %c0_i32_0 = arith.constant 0 : i32
    return %c0_i32, %arg0 : i32, i32
  }
  func.func @transform_3(%arg0: i32) -> (i32, i32) {
    %c0_i32 = arith.constant 0 : i32
    %c0_i32_0 = arith.constant 0 : i32
    return %c0_i32, %arg0 : i32, i32
  }
  func.func @transform_4(%arg0: i32) -> (i32, i32) {
    %c0_i32 = arith.constant 0 : i32
    %c0_i32_0 = arith.constant 0 : i32
    return %c0_i32, %arg0 : i32, i32
  }
  func.func @transform_5(%arg0: i32) -> (i32, i32) {
    %c0_i32 = arith.constant 0 : i32
    %c0_i32_0 = arith.constant 0 : i32
    return %c0_i32, %arg0 : i32, i32
  }
  func.func @transform_6(%arg0: i32) -> (i32, i32) {
    %c0_i32 = arith.constant 0 : i32
    %c0_i32_0 = arith.constant 0 : i32
    return %c0_i32, %arg0 : i32, i32
  }
  func.func @transform_7(%arg0: i32) -> (i32, i32) {
    %c0_i32 = arith.constant 0 : i32
    %c0_i32_0 = arith.constant 0 : i32
    return %c0_i32, %arg0 : i32, i32
  }
  func.func @transform_8(%arg0: i32) -> (i32, i32) {
    %c0_i32 = arith.constant 0 : i32
    %c0_i32_0 = arith.constant 0 : i32
    %c0_i32_1 = arith.constant 0 : i32
    return %c0_i32, %c0_i32_0 : i32, i32
  }
}

</mosaic_0001>

<bundles_post_ra>
// kernel: tpu_custom_call.1
= control target key start
LH: loop header
LB: loop body
LE: loop exit
PB: predicated region body
PF: predicated region fallthrough
CT: control target
= control target key end

     0   :  { %13 = vsyncpa [#allocation5], 0  ;;  %s1047_s0 = inlined_call_operand.hbm [shape: f32[6,256], index: 0, kind: input, shape index: {}]   ;;  %s1048_s1 = inlined_call_operand.hbm [shape: f32[6,256], index: 1, kind: input, shape index: {}]   ;;  %s1049_s2 = inlined_call_operand.hbm [shape: f32[4,256], index: 2, kind: input, shape index: {}]   ;;  %s1050_s3 = inlined_call_operand.hbm [shape: f32[4,256], index: 3, kind: input, shape index: {}]   ;;  %s1051_s4 = inlined_call_operand.hbm [shape: f32[4,256], index: 4, kind: input, shape index: {}]   ;;  %s1052_s5 = inlined_call_operand.hbm [shape: f32[4,256], index: 5, kind: input, shape index: {}]   ;;  %s1053_s6 = inlined_call_operand.hbm [shape: f32[4,256], index: 6, kind: input, shape index: {}]   ;;  %s1054_s7 = inlined_call_operand.hbm [shape: f32[4,256], index: 7, kind: input, shape index: {}]   ;;  %s1055_s8 = inlined_call_operand.hbm [shape: f32[1,1], index: 8, kind: output, shape index: {}]  }
   0x1   :  { %14 = vsyncpa [#allocation8], 0 }
   0x2   :  { %15 = vsyncpa [#allocation11], 0 }
   0x3   :  { %16 = vsyncpa [#allocation14], 0 }
   0x4   :  { %17 = vsyncpa [#allocation17], 0  ;;  %s35_s29 = sshll.u32 %s1048_s1, 4  ;;  %s36_s29 = int_to_ptr.hbm [resolvable:$true] %s35_s29 }
   0x5   :  { %18 = vsyncpa [#allocation6], 0  ;;  %s822_s30 = smov [#allocation7]   ;;  %s57_s12 = sshll.u32 %s1050_s3, 4  ;;  %s58_s12 = int_to_ptr.hbm [resolvable:$true] %s57_s12 }
   0x6   :  { %s37_s9 = sshll.u32 %s822_s30, 4  ;;  %s823_s13 = smov [#allocation10]   ;;  %s38_s9 = int_to_ptr.vmem [resolvable:$true] %s37_s9 }
   0x7   :  { %40 = dma.hbm_to_vmem [thread:$0]  %s36_s29, 256, %s38_s9, [#allocation8]  }
   0x8   :  { %s59_s14 = sshll.u32 %s823_s13, 4  ;;  %s79_s17 = sshll.u32 %s1052_s5, 4  ;;  %s60_s14 = int_to_ptr.vmem [resolvable:$true] %s59_s14  ;;  %s80_s17 = int_to_ptr.hbm [resolvable:$true] %s79_s17 }
   0x9   :  { %62 = dma.hbm_to_vmem [thread:$0]  %s58_s12, 128, %s60_s14, [#allocation11]  }
   0xa   :  { %s24_s19 = sshll.u32 %s1047_s0, 4  ;;  %s824_s20 = smov [#allocation13]   ;;  %s25_s19 = int_to_ptr.hbm [resolvable:$true] %s24_s19 }
   0xb   :  { %s81_s21 = sshll.u32 %s824_s20, 4  ;;  %s825_s3 = smov [#allocation4]   ;;  %s82_s21 = int_to_ptr.vmem [resolvable:$true] %s81_s21 }
   0xc   :  { %84 = dma.hbm_to_vmem [thread:$0]  %s80_s17, 128, %s82_s21, [#allocation14]  }
   0xd   :  { %s26_s22 = sshll.u32 %s825_s3, 4  ;;  %s46_s25 = sshll.u32 %s1049_s2, 4  ;;  %s27_s22 = int_to_ptr.vmem [resolvable:$true] %s26_s22  ;;  %s47_s25 = int_to_ptr.hbm [resolvable:$true] %s46_s25 }
   0xe   :  { %29 = dma.hbm_to_vmem [thread:$0]  %s25_s19, 256, %s27_s22, [#allocation5]  }
   0xf   :  { %s68_s27 = sshll.u32 %s1051_s4, 4  ;;  %s826_s28 = smov [#allocation9]   ;;  %s69_s27 = int_to_ptr.hbm [resolvable:$true] %s68_s27 }
  0x10   :  { %s48_s0 = sshll.u32 %s826_s28, 4  ;;  %s827_s29 = smov [#allocation12]   ;;  %s49_s0 = int_to_ptr.vmem [resolvable:$true] %s48_s0 }
  0x11   :  { %51 = dma.hbm_to_vmem [thread:$0]  %s47_s25, 128, %s49_s0, [#allocation8]  }
  0x12   :  { %s70_s30 = sshll.u32 %s827_s29, 4  ;;  %s90_s11 = sshll.u32 %s1053_s6, 4  ;;  %s71_s30 = int_to_ptr.vmem [resolvable:$true] %s70_s30  ;;  %s91_s11 = int_to_ptr.hbm [resolvable:$true] %s90_s11 }
  0x13   :  { %73 = dma.hbm_to_vmem [thread:$0]  %s69_s27, 128, %s71_s30, [#allocation11]  }
  0x14   :  { %s101_s13 = sshll.u32 %s1054_s7, 4  ;;  %s828_s14 = smov [#allocation15]   ;;  %s102_s13 = int_to_ptr.hbm [resolvable:$true] %s101_s13 }
  0x15   :  { %s92_s4 = sshll.u32 %s828_s14, 4  ;;  %s829_s15 = smov [#allocation16]   ;;  %s93_s4 = int_to_ptr.vmem [resolvable:$true] %s92_s4 }
  0x16   :  { %95 = dma.hbm_to_vmem [thread:$0]  %s91_s11, 128, %s93_s4, [#allocation14]  }
  0x17   :  { %s103_s16 = sshll.u32 %s829_s15, 4  ;;  %s104_s16 = int_to_ptr.vmem [resolvable:$true] %s103_s16 }
  0x18   :  { %106 = dma.hbm_to_vmem [thread:$0]  %s102_s13, 128, %s104_s16, [#allocation17]  }
  0x19   :  { %810 = dma.done.wait [#allocation5], 256  }
  0x1a   :  { %811 = vsyncadd [#allocation5], 4294967040 }
  0x1b   :  { %812 = dma.done.wait [#allocation8], 384  }
  0x1c   :  { %813 = vsyncadd [#allocation8], 4294966912 }
  0x1d   :  { %814 = dma.done.wait [#allocation11], 256  }
  0x1e   :  { %815 = vsyncadd [#allocation11], 4294967040 }
  0x1f   :  { %816 = dma.done.wait [#allocation14], 256  }
  0x20   :  { %817 = vsyncadd [#allocation14], 4294967040 }
  0x21   :  { %818 = dma.done.wait [#allocation17], 128  }
  0x22   :  { %819 = vsyncadd [#allocation17], 4294967168  ;;  %v143_v0 = vlaneseq  ;;  %v830_v2 = vmov 0.0   ;;  %v157_v3 = vld [vmem:[#allocation10] sm:$0xff]  ;;  %v158_v4 = vld [vmem:[#allocation9] sm:$0xff]  ;;  %vm169_vm1 = vcmask 1042432  }
  0x23   :  { %v159_v5 = vsub.f32 %v157_v3, %v158_v4  ;;  %v161_v7 = vld [vmem:[#allocation13] sm:$0xff]  ;;  %v162_v8 = vld [vmem:[#allocation12] sm:$0xff]  ;;  %v151_v10 = vld [vmem:[#allocation4] sm:$0x3f]  ;;  %vm210_vm4 = vcmask 1041408   ;;  %vm346_vm5 = vcmask 1043458  }
  0x24   :  { %vm902_vm0 = vcmp.lt.s32.totalorder %v143_v0, 256  ;;  %v149_v9 = vld [vmem:[#allocation7] sm:$0x3f]  ;;  %v163_v11 = vsub.f32 %v161_v7, %v162_v8  ;;  %v150_v12 = vld [vmem:[#allocation7 + $0x8] sm:$0x3f]  ;;  %v165_v17 = vld [vmem:[#allocation16] sm:$0xff] }
  0x25   :  { %148 = vst.msk [vmem:[#allocation3] sm:$0x3] %vm902_vm0, %v830_v2  ;;  %v160_v6 = vand.u32 2147483647, %v159_v5  ;;  %v152_v13 = vld [vmem:[#allocation4 + $0x8] sm:$0x3f]  ;;  %v153_v14 = vsub.f32 %v149_v9, %v151_v10 }
  0x26   :  { %147 = vst.msk [vmem:[#allocation2] sm:$0x3] %vm902_vm0, %v830_v2  ;;  %v912_v15 = vand.u32 2147483647, %v163_v11  ;;  %v154_v16 = vsub.f32 %v150_v12, %v152_v13  ;;  %v166_v18 = vld [vmem:[#allocation15] sm:$0xff]  ;;  %s831_s6 = smov [#allocation18]  }
  0x27   :  { %205 = vst [vmem:[#allocation1] ss:$2 sm:$0xff] %v160_v6  ;;  %v914_v20 = vand.u32 2147483647, %v153_v14  ;;  %v167_v22 = vsub.f32 %v165_v17, %v166_v18  ;;  %s546_s7 = sshll.u32 %s831_s6, 4  ;;  %s548_s18 = sshll.u32 %s1055_s8, 4  ;;  %s547_s7 = int_to_ptr.vmem [resolvable:$true] %s546_s7  ;;  %s549_s18 = int_to_ptr.hbm [resolvable:$true] %s548_s18 }
  0x28   :  { %v917_v23 = vand.u32 2147483647, %v154_v16 }
  0x29   :  { %v170_v24 = vsel %vm169_vm1, %v914_v20, 0.0  ;;  %vm184_vm2 = vcmp.gt.f32.partialorder %v914_v20, 0.0  ;;  %v924_v26 = vand.u32 2147483647, %v167_v22  ;;  %v303_v14 = vrot.slane %v914_v20, 3 }
  0x2a   :  { %v177_v25 = vsel %vm169_vm1, %v917_v23, 0.0  ;;  %v171_v27 = vrot.slane %v170_v24, 4  ;;  %vm185_vm3 = vcmp.gt.f32.partialorder %v917_v23, 0.0  ;;  %v930_v29 = vsel %vm184_vm2, 1.0, %v830_v2 }
  0x2b   :  { %v178_v28 = vrot.slane %v177_v25, 4  ;;  %v935_v35 = vsel %vm185_vm3, 1.0, %v830_v2  ;;  %v190_v38 = vsel %vm169_vm1, %v930_v29, 0.0  ;;  %v304_v17 = vrot.slane %v917_v23, 3 }
  0x2c   :  { %v172_v34 = vadd.f32 %v171_v27, %v170_v24  ;;  %v197_v43 = vsel %vm169_vm1, %v935_v35, 0.0  ;;  %v191_v47 = vrot.slane %v190_v38, 4  ;;  %v323_v22 = vrot.slane %v930_v29, 3 }
  0x2d   :  { %v179_v42 = vadd.f32 %v178_v28, %v177_v25  ;;  %v198_v49 = vrot.slane %v197_v43, 4  ;;  %v324_v28 = vrot.slane %v935_v35, 3 }
  0x2e   :  { %v206_v19 = vld.sshfl [vmem:[#allocation1] sm:$0xff pattern:$0x75316420]  ;;  %v207_v21 = vld.sshfl [vmem:[#allocation1 + $0x8] sm:$0xff pattern:$0x75316420]  ;;  %v192_v57 = vadd.f32 %v191_v47, %v190_v38 }
  0x2f   :  { %232 = vst [vmem:[#allocation1] ss:$2 sm:$0xff] %v912_v15  ;;  %v211_v30 = vsel %vm210_vm4, %v206_v19, -inf  ;;  %v218_v31 = vsel %vm210_vm4, %v207_v21, -inf  ;;  %v173_v48 = vrot.slane %v172_v34, 2  ;;  %v180_v51 = vrot.slane %v179_v42, 2 }
  0x30   :  { %v212_v39 = vrot.slane %v211_v30, 4  ;;  %v219_v44 = vrot.slane %v218_v31, 4  ;;  %v199_v60 = vadd.f32 %v198_v49, %v197_v43  ;;  %v193_v9 = vrot.slane %v192_v57, 2 }
  0x31   :  { %v946_v3 = vadd.f32 %v173_v48, %v172_v34  ;;  %v948_v5 = vadd.f32 %v180_v51, %v179_v42  ;;  %v327_v43 = vsel %vm169_vm1, %v323_v22, 0.0 }
  0x32   :  { %v213_v50 = vmax.f32 %v211_v30, %v212_v39  ;;  %v220_v52 = vmax.f32 %v218_v31, %v219_v44  ;;  %v200_v12 = vrot.slane %v199_v60, 2  ;;  %v955_v24 = vadd.f32 %v193_v9, %v192_v57 }
  0x33   :  { %v182_v18 = vrot.slane %v948_v5, 1  ;;  %v334_v44 = vsel %vm169_vm1, %v324_v28, 0.0 }
  0x34   :  { %v214_v61 = vrot.slane %v213_v50, 2  ;;  %v221_v4 = vrot.slane %v220_v52, 2  ;;  %v958_v31 = vadd.f32 %v200_v12, %v199_v60 }
  0x36   :  { %v233_v32 = vld.sshfl [vmem:[#allocation1] sm:$0xff pattern:$0x75316420]  ;;  %v234_v33 = vld.sshfl [vmem:[#allocation1 + $0x8] sm:$0xff pattern:$0x75316420]  ;;  %v215_v13 = vmax.f32 %v213_v50, %v214_v61  ;;  %v222_v16 = vmax.f32 %v220_v52, %v221_v4 }
  0x37   :  { %v237_v36 = vsel %vm210_vm4, %v233_v32, -inf  ;;  %v244_v37 = vsel %vm210_vm4, %v234_v33, -inf  ;;  %262 = vst [vmem:[#allocation1] ss:$2 sm:$0xff] %v924_v26  ;;  %v307_v33 = vsel %vm169_vm1, %v303_v14, 0.0  ;;  %v328_v52 = vrot.slane %v327_v43, 4 }
  0x38   :  { %v238_v40 = vrot.slane %v237_v36, 4  ;;  %v245_v41 = vrot.slane %v244_v37, 4  ;;  %v216_v32 = vrot.slane %v215_v13, 1  ;;  %v223_v23 = vrot.slane %v222_v16, 1 }
  0x39   :  { %v308_v51 = vrot.slane %v307_v33, 4  ;;  %v972_v4 = vadd.f32 %v328_v52, %v327_v43 }
  0x3a   :  { %v239_v45 = vmax.f32 %v237_v36, %v238_v40  ;;  %v246_v46 = vmax.f32 %v244_v37, %v245_v41  ;;  %v314_v36 = vsel %vm169_vm1, %v304_v17, 0.0  ;;  %v217_v49 = vmax.f32 %v215_v13, %v216_v32 }
  0x3b   :  { %v224_v50 = vmax.f32 %v222_v16, %v223_v23  ;;  %v309_v60 = vadd.f32 %v308_v51, %v307_v33  ;;  %v330_v22 = vrot.slane %v972_v4, 2 }
  0x3c   :  { %v240_v53 = vrot.slane %v239_v45, 2  ;;  %v247_v54 = vrot.slane %v246_v46, 2  ;;  %vm225_vm8 = vcmp.gt.f32.partialorder %v217_v49, 0.5 }
  0x3d   :  { %vm226_vm9 = vcmp.gt.f32.partialorder %v224_v50, 0.5 }
  0x3e   :  { %v263_v55 = vld.sshfl [vmem:[#allocation1] sm:$0xff pattern:$0x75316420]  ;;  %v264_v56 = vld.sshfl [vmem:[#allocation1 + $0x8] sm:$0xff pattern:$0x75316420]  ;;  %v241_v7 = vmax.f32 %v239_v45, %v240_v53  ;;  %v248_v8 = vmax.f32 %v246_v46, %v247_v54 }
  0x3f   :  { %v267_v58 = vsel %vm210_vm4, %v263_v55, -inf  ;;  %v274_v59 = vsel %vm210_vm4, %v264_v56, -inf  ;;  %341 = vst [vmem:[#allocation1] ss:$2 sm:$0xff] %v160_v6  ;;  %v175_v6 = vrot.slane %v946_v3, 1  ;;  %v195_v45 = vrot.slane %v955_v24, 1 }
  0x40   :  { %v268_v62 = vrot.slane %v267_v58, 4  ;;  %v275_v63 = vrot.slane %v274_v59, 4  ;;  %v242_v19 = vrot.slane %v241_v7, 1  ;;  %v249_v21 = vrot.slane %v248_v8, 1 }
  0x41   :  { %v202_v46 = vrot.slane %v958_v31, 1  ;;  %v335_v53 = vrot.slane %v334_v44, 4  ;;  %v565_v17 = vsel %vm226_vm9, 1.0, %v830_v2  ;;  %vm443_vm9 = vcmask 1040384  }
  0x42   :  { %v269_v10 = vmax.f32 %v267_v58, %v268_v62  ;;  %v276_v11 = vmax.f32 %v274_v59, %v275_v63  ;;  %v243_v38 = vmax.f32 %v241_v7, %v242_v19  ;;  %v250_v39 = vmax.f32 %v248_v8, %v249_v21 }
  0x43   :  { %v974_v7 = vadd.f32 %v335_v53, %v334_v44  ;;  %v310_v19 = vrot.slane %v309_v60, 2 }
  0x44   :  { %v270_v25 = vrot.slane %v269_v10, 2  ;;  %v277_v27 = vrot.slane %v276_v11, 2  ;;  %vm251_vm6 = vcmp.gt.f32.partialorder %v243_v38, 0.5  ;;  %vm252_vm7 = vcmp.gt.f32.partialorder %v250_v39, 0.5 }
  0x45   :  { %v566_v8 = vsel %vm251_vm6, 1.0, %v830_v2  ;;  %v567_v9 = vsel %vm252_vm7, 1.0, %v830_v2 }
  0x46   :  { %v342_v30 = vld.sshfl [vmem:[#allocation1] sm:$0xff pattern:$0x75316420]  ;;  %v343_v34 = vld.sshfl [vmem:[#allocation1 + $0x8] sm:$0xff pattern:$0x75316420]  ;;  %v271_v41 = vmax.f32 %v269_v10, %v270_v25  ;;  %v278_v42 = vmax.f32 %v276_v11, %v277_v27 }
  0x47   :  { %v347_v37 = vsel %vm346_vm5, %v342_v30, -inf  ;;  %v354_v29 = vsel %vm346_vm5, %v343_v34, -inf  ;;  %367 = vst [vmem:[#allocation1] ss:$2 sm:$0xff] %v912_v15  ;;  %v315_v15 = vrot.slane %v314_v36, 4  ;;  %v337_v25 = vrot.slane %v974_v7, 2 }
  0x48   :  { %v348_v35 = vrot.slane %v347_v37, 4  ;;  %v355_v40 = vrot.slane %v354_v29, 4  ;;  %v272_v54 = vrot.slane %v271_v41, 1  ;;  %v279_v55 = vrot.slane %v278_v42, 1 }
  0x49   :  { %v316_v61 = vadd.f32 %v315_v15, %v314_v36  ;;  %v257_v30 = vmul.f32 0.8, %v566_v8  ;;  %v258_v32 = vmul.f32 0.8, %v567_v9 }
  0x4a   :  { %v349_v47 = vmax.f32 %v347_v37, %v348_v35  ;;  %v356_v48 = vmax.f32 %v354_v29, %v355_v40  ;;  %v273_v10 = vmax.f32 %v271_v41, %v272_v54  ;;  %v280_v11 = vmax.f32 %v278_v42, %v279_v55 }
  0x4b   :  { %v317_v21 = vrot.slane %v316_v61, 2  ;;  %v987_v37 = vadd.f32 %v175_v6, %v946_v3  ;;  %v992_v29 = vadd.f32 %v182_v18, %v948_v5  ;;  %v260_v18 = vadd.f32 %v565_v17, %v258_v32 }
  0x4c   :  { %v350_v56 = vrot.slane %v349_v47, 2  ;;  %v357_v57 = vrot.slane %v356_v48, 2  ;;  %vm281_vm10 = vcmp.gt.f32.partialorder %v273_v10, 0.5  ;;  %vm282_vm11 = vcmp.gt.f32.partialorder %v280_v11, 0.5 }
  0x4d   :  { %v568_v43 = vsel %vm281_vm10, 1.0, %v830_v2  ;;  %v569_v44 = vsel %vm282_vm11, 1.0, %v830_v2 }
  0x4e   :  { %v368_v58 = vld.sshfl [vmem:[#allocation1] sm:$0xff pattern:$0x75316420]  ;;  %v369_v59 = vld.sshfl [vmem:[#allocation1 + $0x8] sm:$0xff pattern:$0x75316420]  ;;  %v351_v12 = vmax.f32 %v349_v47, %v350_v56  ;;  %v358_v13 = vmax.f32 %v356_v48, %v357_v57  ;;  %v311_v56 = vadd.f32 %v310_v19, %v309_v60  ;;  %v318_v57 = vadd.f32 %v317_v21, %v316_v61 }
  0x4f   :  { %v372_v62 = vsel %vm346_vm5, %v368_v58, -inf  ;;  %v379_v63 = vsel %vm346_vm5, %v369_v59, -inf  ;;  %396 = vst [vmem:[#allocation1] ss:$2 sm:$0xff] %v924_v26  ;;  %v564_v26 = vsel %vm225_vm8, 1.0, %v830_v2 }
  0x50   :  { %v373_v14 = vrot.slane %v372_v62, 4  ;;  %v380_v16 = vrot.slane %v379_v63, 4  ;;  %v352_v33 = vrot.slane %v351_v12, 1  ;;  %v359_v34 = vrot.slane %v358_v13, 1 }
  0x51   :  { %v259_v5 = vadd.f32 %v564_v26, %v257_v30  ;;  %v287_v52 = vmul.f32 0.6, %v568_v43  ;;  %v288_v53 = vmul.f32 0.6, %v569_v44  ;;  %v312_v26 = vrot.slane %v311_v56, 1 }
  0x52   :  { %v374_v27 = vmax.f32 %v372_v62, %v373_v14  ;;  %v381_v28 = vmax.f32 %v379_v63, %v380_v16  ;;  %v353_v6 = vmax.f32 %v351_v12, %v352_v33  ;;  %v360_v48 = vmax.f32 %v358_v13, %v359_v34 }
  0x53   :  { %v289_v10 = vadd.f32 %v287_v52, %v259_v5  ;;  %v290_v11 = vadd.f32 %v288_v53, %v260_v18  ;;  %v331_v12 = vadd.f32 %v330_v22, %v972_v4  ;;  %v338_v13 = vadd.f32 %v337_v25, %v974_v7  ;;  %v439_v52 = vld [vmem:[#allocation2] sm:$0x3] }
  0x54   :  { %v375_v23 = vrot.slane %v374_v27, 2  ;;  %v382_v36 = vrot.slane %v381_v28, 2  ;;  %vm361_vm12 = vcmp.gt.f32.partialorder %v353_v6, 0.5  ;;  %vm362_vm13 = vcmp.gt.f32.partialorder %v360_v48, 0.5 }
  0x55   :  { %v319_v17 = vrot.slane %v318_v57, 1  ;;  %v572_v19 = vsel %vm361_vm12, 1.0, %v830_v2  ;;  %v573_v21 = vsel %vm362_vm13, 1.0, %v830_v2  ;;  %v203_v4 = vadd.f32 %v202_v46, %v958_v31 }
  0x56   :  { %v397_v38 = vld.sshfl [vmem:[#allocation1] sm:$0xff pattern:$0x75316420]  ;;  %v398_v39 = vld.sshfl [vmem:[#allocation1 + $0x8] sm:$0xff pattern:$0x75316420]  ;;  %v376_v35 = vmax.f32 %v374_v27, %v375_v23  ;;  %v383_v40 = vmax.f32 %v381_v28, %v382_v36  ;;  %v196_v27 = vadd.f32 %v195_v45, %v955_v24  ;;  %v313_v33 = vadd.f32 %v312_v26, %v311_v56 }
  0x57   :  { %v401_v41 = vsel %vm346_vm5, %v397_v38, -inf  ;;  %v408_v42 = vsel %vm346_vm5, %v398_v39, -inf  ;;  %vm293_vm1 = vcmp.gt.f32.partialorder %v289_v10, 0.0  ;;  %vm294_vm3 = vcmp.gt.f32.partialorder %v290_v11, 0.0 }
  0x58   :  { %v402_v47 = vrot.slane %v401_v41, 4  ;;  %v409_v3 = vrot.slane %v408_v42, 4  ;;  %v377_v49 = vrot.slane %v376_v35, 1  ;;  %v384_v50 = vrot.slane %v383_v40, 1  ;;  %vm470_vm8 = vmand %vm184_vm2, %vm293_vm1 }
  0x59   :  { %v332_v25 = vrot.slane %v331_v12, 1  ;;  %v339_v28 = vrot.slane %v338_v13, 1  ;;  %v320_v34 = vadd.f32 %v319_v17, %v318_v57  ;;  %v570_v45 = vsel %vm293_vm1, 1.0, %v830_v2 }
  0x5a   :  { %v403_v51 = vmax.f32 %v401_v41, %v402_v47  ;;  %v410_v15 = vmax.f32 %v408_v42, %v409_v3  ;;  %v378_v54 = vmax.f32 %v376_v35, %v377_v49  ;;  %v385_v55 = vmax.f32 %v383_v40, %v384_v50 }
  0x5b   :  { %v571_v31 = vsel %vm294_vm3, 1.0, %v830_v2  ;;  %v333_v38 = vadd.f32 %v332_v25, %v331_v12  ;;  %v340_v39 = vadd.f32 %v339_v28, %v338_v13  ;;  %v291_v35 = vmul.f32 %v289_v10, %v987_v37 }
  0x5c   :  { %v404_v58 = vrot.slane %v403_v51, 2  ;;  %v411_v59 = vrot.slane %v410_v15, 2  ;;  %vm386_vm14 = vcmp.gt.f32.partialorder %v378_v54, 0.5  ;;  %vm387_vm15 = vcmp.gt.f32.partialorder %v385_v55, 0.5  ;;  %v452_v54 = vld [vmem:[#allocation3] sm:$0x3] }
  0x5d   :  { %v574_v62 = vsel %vm386_vm14, 1.0, %v830_v2  ;;  %v575_v63 = vsel %vm387_vm15, 1.0, %v830_v2  ;;  %v292_v40 = vmul.f32 %v290_v11, %v992_v29  ;;  %v299_v43 = vmul.f32 %v570_v45, %v196_v27 }
  0x5e   :  { %v405_v8 = vmax.f32 %v403_v51, %v404_v58  ;;  %v412_v9 = vmax.f32 %v410_v15, %v411_v59  ;;  %v392_v60 = vmul.f32 0.8, %v574_v62  ;;  %v393_v61 = vmul.f32 0.8, %v575_v63 }
  0x5f   :  { %v300_v44 = vmul.f32 %v571_v31, %v203_v4  ;;  %v468_v37 = vmul.f32 %v289_v10, %v914_v20  ;;  %v464_v56 = vand.u32 127, %v143_v0  ;;  %v580_v57 = vsel %vm470_vm8, 1.0, %v830_v2 }
  0x60   :  { %v406_v14 = vrot.slane %v405_v8, 1  ;;  %v413_v16 = vrot.slane %v412_v9, 1  ;;  %v394_v30 = vadd.f32 %v572_v19, %v392_v60  ;;  %v395_v32 = vadd.f32 %v573_v21, %v393_v61 }
  0x61   :  { %v477_v58 = vsub.f32 0.0001, %v468_v37  ;;  %v489_v20 = vsub.f32 1.0, %v580_v57  ;;  %vm466_vm2 = vcmp.eq.s32.totalorder %v464_v56, 0  ;;  %vm539_vm13 = vcmask 0  }
  0x62   :  { %v407_v7 = vmax.f32 %v405_v8, %v406_v14  ;;  %v414_v22 = vmax.f32 %v412_v9, %v413_v16  ;;  %v483_v9 = vrot.slane %v830_v2, 7 }
  0x63   :  { %v479_v8 = vsel %vm466_vm2, %v477_v58, 0.0  ;;  %v491_v10 = vsel %vm466_vm2, %v489_v20, 0.0 }
  0x64   :  { %vm415_vm4 = vcmp.gt.f32.partialorder %v407_v7, 0.5  ;;  %vm416_vm5 = vcmp.gt.f32.partialorder %v414_v22, 0.5  ;;  %v484_v0 = vsel %vm443_vm9, %v479_v8, %v483_v9  ;;  %v496_v11 = vsel %vm443_vm9, %v491_v10, %v483_v9 }
  0x65   :  { %v576_v23 = vsel %vm415_vm4, 1.0, %v830_v2  ;;  %v577_v24 = vsel %vm416_vm5, 1.0, %v830_v2 }
  0x66   :  { %v421_v46 = vmul.f32 0.6, %v576_v23  ;;  %v422_v36 = vmul.f32 0.6, %v577_v24 }
  0x68   :  { %v423_v41 = vadd.f32 %v421_v46, %v394_v30  ;;  %v424_v42 = vadd.f32 %v422_v36, %v395_v32 }
  0x6a   :  { %v425_v47 = vmul.f32 %v423_v41, %v313_v33  ;;  %v426_v3 = vmul.f32 %v424_v42, %v320_v34  ;;  %vm427_vm6 = vcmp.gt.f32.partialorder %v423_v41, 0.0  ;;  %vm428_vm7 = vcmp.gt.f32.partialorder %v424_v42, 0.0 }
  0x6b   :  { %v578_v6 = vsel %vm427_vm6, 1.0, %v830_v2  ;;  %v579_v48 = vsel %vm428_vm7, 1.0, %v830_v2 }
  0x6c   :  { %v433_v49 = vmul.f32 %v578_v6, %v333_v38  ;;  %v434_v50 = vmul.f32 %v579_v48, %v340_v39  ;;  %v435_v5 = vadd.f32 %v425_v47, %v291_v35  ;;  %v436_v18 = vadd.f32 %v426_v3, %v292_v40 }
  0x6e   :  { %v437_v29 = vadd.f32 %v433_v49, %v299_v43  ;;  %v438_v51 = vadd.f32 %v434_v50, %v300_v44  ;;  %v442_v15 = vrot.slane %v436_v18, 7 }
  0x70   :  { %v444_v53 = vsel %vm443_vm9, %v435_v5, %v442_v15  ;;  %v455_v55 = vrot.slane %v438_v51, 7 }
  0x71   :  { %v446_v59 = vadd.f32 %v444_v53, %v439_v52 }
  0x72   :  { %v456_v62 = vsel %vm443_vm9, %v437_v29, %v455_v55 }
  0x73   :  { %v458_v63 = vadd.f32 %v456_v62, %v452_v54  ;;  %451 = vst.msk [vmem:[#allocation2] sm:$0x3] %vm902_vm0, %v446_v59 }
  0x75   :  { %459 = vst.msk [vmem:[#allocation3] sm:$0x3] %vm902_vm0, %v458_v63 }
  0x7a   :  { %v476_v12 = vld [vmem:[#allocation2] sm:$0x3] }
  0x7b   :  { %v486_v13 = vadd.f32 %v484_v0, %v476_v12 }
  0x7c   :  { %v488_v60 = vld [vmem:[#allocation3] sm:$0x3] }
  0x7d   :  { %v498_v61 = vadd.f32 %v496_v11, %v488_v60  ;;  %487 = vst.msk [vmem:[#allocation2] sm:$0x3] %vm902_vm0, %v486_v13 }
  0x7f   :  { %499 = vst.msk [vmem:[#allocation3] sm:$0x3] %vm902_vm0, %v498_v61 }
  0x84   :  { %v500_v16 = vld [vmem:[#allocation2] sm:$0x3] }
  0x85   :  { %v502_v21 = vperm.slane %v500_v16, 0  ;;  %v503_v27 = vperm.slane %v500_v16, 1 }
  0x86   :  { %v511_v14 = vld [vmem:[#allocation3] sm:$0x3] }
  0x87   :  { %v513_v26 = vperm.slane %v511_v14, 0  ;;  %v514_v17 = vperm.slane %v511_v14, 1  ;;  %v506_v7 = vsel %vm443_vm9, %v502_v21, 0.0  ;;  %v507_v22 = vsel %vm443_vm9, %v503_v27, 0.0 }
  0x88   :  { %v508_v25 = vadd.f32 %v507_v22, %v506_v7 }
  0x89   :  { %v517_v2 = vsel %vm443_vm9, %v513_v26, 0.0  ;;  %v518_v19 = vsel %vm443_vm9, %v514_v17, 0.0 }
  0x8a   :  { %v519_v4 = vadd.f32 %v518_v19, %v517_v2 }
  0x8c   :  { %520 = vadd.xlane.f32.xlu0 %v519_v4 }
  0x94   :  { %509 = vadd.xlane.f32.xlu0 %v508_v25 }
  0xff   :  { %v521_v1 = vpop.xlane.xlu0 %520 }
 0x100   :  { %592 = vrcp.f32 %v521_v1  ;;  %v533_v33 = vand.u32 2147483648, %v521_v1  ;;  %v531_v23 = vand.u32 2147483647, %v521_v1  ;;  %vm527_vm10 = vweird.f32 %v521_v1 }
 0x102   :  { %v534_v45 = vor.u32 1.1754944e-38, %v533_v33  ;;  %vm532_vm12 = vcmp.eq.f32.partialorder %v531_v23, 8.507059e+37 }
 0x106   :  { %v593_v28 = vpop.eup %592 }
 0x107   :  { %v523_v30 = vmul.f32 %v593_v28, %v521_v1  ;;  %vm528_vm0 = vweird.f32 %v593_v28  ;;  %v510_v31 = vpop.xlane.xlu0 %509 }
 0x108   :  { %vm529_vm11 = vmor %vm527_vm10, %vm528_vm0 }
 0x109   :  { %v524_v32 = vsub.f32 1.0, %v523_v30 }
 0x10b   :  { %v525_v34 = vmul.f32 %v593_v28, %v524_v32 }
 0x10d   :  { %v526_v24 = vadd.f32 %v593_v28, %v525_v34 }
 0x10f   :  { %v530_v46 = vsel %vm529_vm11, %v593_v28, %v526_v24 }
 0x110   :  { %v535_v36 = vsel %vm532_vm12, %v534_v45, %v530_v46 }
 0x111   :  { %v536_v38 = vmul.f32 %v535_v36, %v510_v31 }
 0x113   :  { %vm537_vm14 = vcmp.lt.f32.partialorder %v536_v38, 0.002 }
 0x114   :  { %v538_v39 = vsel %vm537_vm14, 0.0, %v536_v38 }
 0x115   :  { %540 = vst.msk [vmem:[#allocation18] sm:$0x1] %vm539_vm13, %v538_v39 }
 0x116   :  { %551 = dma.vmem_to_hbm [thread:$0]  %s547_s7, 16, %s549_s18, [#allocation6]  }
 0x117   :  { %820 = dma.done.wait [#allocation6], 16  }
 0x118   :  { %821 = vsyncadd [#allocation6], 4294967280 }
 0x119   :  { %556 = vsyncpa [#allocation5], 1 }
 0x11a   :  { %557 = vsyncpa [#allocation8], 1 }
 0x11b   :  { %558 = vsyncpa [#allocation11], 1 }
 0x11c   :  { %559 = vsyncpa [#allocation14], 1 }
 0x11d   :  { %560 = vsyncpa [#allocation17], 1 }
 0x11e   :  { %561 = vsyncpa [#allocation6], 1 }

</bundles_post_ra>
